<compile_context>
chip_gen: v7x
topology: tpu7x:2x2x1
jax: 0.10.0
libtpu: 0.0.40
codegen_flags: <defaults>
</compile_context>

<pallas_src>
import functools

import jax
import jax.numpy as jnp
from jax import lax
from jax.experimental import pallas as pl
from jax.experimental.pallas import tpu as pltpu


def _round_up(x, m):
    return ((x + m - 1) // m) * m


def _vmem_capacity_bytes():
    try:
        return int(pltpu.get_tpu_info().vmem_capacity_bytes)
    except Exception:
        return 64 * 1024 * 1024  # conservative (v7x per-TC VMEM)


def _pick_tile_n(v_pad, target, max_tile=None):
    """Largest multiple of 128 that divides v_pad, within [128, limit]."""
    limit = min(v_pad, max_tile if max_tile is not None else 2 * target)
    limit = max(128, limit)
    best = 128
    for d in range(128, limit + 1, 128):
        if v_pad % d == 0:
            best = d
    return best


def _policy_head_kernel(x_ref, w_ref, b_ref, o_ref, *, compute_dtype):
    # x_ref: [tm, H]  bf16 activation tile
    # w_ref: [tn, H]  weight tile in natural [V, H] layout
    # b_ref: [1, tn]  f32 bias tile
    # o_ref: [tm, tn] output tile (lane-dense, tn multiple of 128)
    x = x_ref[...].astype(compute_dtype)
    w = w_ref[...].astype(compute_dtype)
    # Contract the hidden axis of both operands: x @ w.T on the MXU, f32 acc.
    acc = lax.dot_general(
        x, w,
        dimension_numbers=(((1,), (1,)), ((), ())),
        preferred_element_type=jnp.float32,
    )
    o_ref[...] = (acc + b_ref[...].astype(jnp.float32)).astype(o_ref.dtype)


def policy_head(hidden_states, weight, bias, *, tile_m=512, tile_n=512,
                compute_dtype=jnp.bfloat16, out_dtype=jnp.float32):
    """policy_logits = hidden_states @ weight.T + bias.

    hidden_states: [B, S, H]; weight: [V, H]; bias: [V]  ->  [B, S, V']
    (V' == V unless the vocab had to be padded inside this call; the class
    wrapper pre-pads parameters at init so V' == stored V there.)
    """
    B, S, H = hidden_states.shape
    V, Hw = weight.shape
    assert Hw == H, "weight hidden dim must match hidden_states"
    M = B * S

    # bf16 activations into the kernel: results identical to casting in-kernel
    # (kernel rounds to compute_dtype anyway) but halves x HBM traffic & VMEM.
    x = hidden_states.reshape(M, H).astype(compute_dtype)

    # --- vocab padding (no-op when parameters were pre-padded at init) ------
    V_pad = _round_up(V, 128)
    w, b = weight, bias
    v_padded_here = V_pad != V
    if v_padded_here:
        # TODO(synk): production callers should pre-pad parameters once at
        # init (PolicyNetworkPallas does) to avoid this per-call HBM copy.
        w = jnp.pad(w, ((0, V_pad - V), (0, 0)))
        b = jnp.pad(b, (0, V_pad - V))
    b2 = b.astype(jnp.float32).reshape(1, V_pad)

    # --- tile selection ------------------------------------------------------
    decode = M <= 256                      # GEMV-style single weight sweep
    tn_target = 2048 if decode else tile_n
    tn = _pick_tile_n(V_pad, tn_target)    # always divides V_pad
    tm = min(_round_up(tile_m, 8), _round_up(M, 8))

    cap = _vmem_capacity_bytes()
    budget = (cap * 3) // 4                # ~48 MiB on v7x, ~96 MiB on v5e/v6e
    out_isz = jnp.dtype(out_dtype).itemsize
    x_isz = x.dtype.itemsize
    w_isz = w.dtype.itemsize

    # Deeper weight pipelining only for decode sweeps on big-VMEM chips.
    wbuf = 3 if (decode and (V_pad // tn) >= 4 and cap >= 100 * 1024 * 1024) else 2

    def est(tm_, tn_, wbuf_):
        return (2 * tm_ * H * x_isz            # double-buffered activations
                + wbuf_ * tn_ * H * w_isz      # weight buffers
                + 2 * tm_ * tn_ * out_isz      # output buffers
                + 2 * tn_ * 4                  # bias buffers
                + tm_ * tn_ * 4)               # Mosaic f32 MXU result staging

    # Auto-shrink if the estimate does not fit the per-chip budget.
    while est(tm, tn, wbuf) > budget and tm > 128:
        tm = max(128, _round_up(tm // 2, 8))
    while est(tm, tn, wbuf) > budget and tn > 128:
        tn = _pick_tile_n(V_pad, tn, max_tile=tn - 128)  # strictly smaller
        if wbuf == 3:
            wbuf = 2
    # TODO(synk): if even (128, 128) tiles overflow (H >~ 16k), add a K grid
    # axis with an f32 VMEM accumulator instead of shrinking further.

    M_pad = _round_up(M, tm)
    if M_pad != M:
        x = jnp.pad(x, ((0, M_pad - M), (0, 0)))

    grid_m = M_pad // tm
    grid_n = V_pad // tn

    w_spec_extra = {}
    if wbuf == 3 and hasattr(pl, "Buffered"):
        w_spec_extra["pipeline_mode"] = pl.Buffered(3)

    if grid_m >= grid_n:
        # x tile resident across the inner vocab sweep; weight streams.
        grid = (grid_m, grid_n)
        in_specs = [
            pl.BlockSpec((tm, H), lambda i, j: (i, 0)),                 # x
            pl.BlockSpec((tn, H), lambda i, j: (j, 0), **w_spec_extra),  # W [V,H]
            pl.BlockSpec((1, tn), lambda i, j: (0, j)),                 # bias
        ]
        out_spec = pl.BlockSpec((tm, tn), lambda i, j: (i, j))
        w_bytes = grid_m * V_pad * H * w_isz
        x_bytes = M_pad * H * x_isz
    else:
        # Decode / small-M: put the (large) vocab axis first so megacore
        # shards the weight sweep across both v7x TensorCores.
        grid = (grid_n, grid_m)
        in_specs = [
            pl.BlockSpec((tm, H), lambda j, i: (i, 0)),                 # x
            pl.BlockSpec((tn, H), lambda j, i: (j, 0), **w_spec_extra),  # W [V,H]
            pl.BlockSpec((1, tn), lambda j, i: (0, j)),                 # bias
        ]
        out_spec = pl.BlockSpec((tm, tn), lambda j, i: (i, j))
        w_bytes = V_pad * H * w_isz
        x_bytes = grid_n * M_pad * H * x_isz

    vmem_limit = int(min(budget,
                         max(32 * 1024 * 1024, int(est(tm, tn, wbuf) * 1.25))))

    cost = pl.CostEstimate(
        flops=2 * M_pad * V_pad * H,
        transcendentals=0,
        bytes_accessed=w_bytes + x_bytes + M_pad * V_pad * out_isz + V_pad * 4,
    )

    out = pl.pallas_call(
        functools.partial(_policy_head_kernel, compute_dtype=compute_dtype),
        out_shape=jax.ShapeDtypeStruct((M_pad, V_pad), out_dtype),
        grid_spec=pltpu.PrefetchScalarGridSpec(
            num_scalar_prefetch=0,
            grid=grid,
            in_specs=in_specs,
            out_specs=out_spec,
        ),
        compiler_params=pltpu.CompilerParams(
            dimension_semantics=("parallel", "parallel"),
            vmem_limit_bytes=vmem_limit,
        ),
        cost_estimate=cost,
    )(x, w, b2)

    # Only slice when padding actually happened (slices are HBM copies).
    if M_pad != M:
        out = out[:M]
    if v_padded_here:
        out = out[:, :V]
    return out.reshape(B, S, out.shape[-1])


class PolicyNetworkPallas:
    """Pallas equivalent of PolicyNetwork.forward (policy_head path).

    # TODO(synk): base_model (a HuggingFace transformer) is not translated;
    # this forward requires hidden_states, matching the
    # `hidden_states is not None` branch of the PyTorch module.
    """

    def __init__(self, hidden_size, vocab_size, key, param_dtype=jnp.bfloat16):
        kw, kb = jax.random.split(key)
        bound = 1.0 / float(hidden_size) ** 0.5
        # nn.Linear layout: W [V, H], b [V]. Weight stored bf16 (MXU operand
        # dtype, halves weight HBM traffic); bias kept f32 for the epilogue.
        w = jax.random.uniform(
            kw, (vocab_size, hidden_size), jnp.float32, -bound, bound
        ).astype(param_dtype)
        b = jax.random.uniform(kb, (vocab_size,), jnp.float32, -bound, bound)

        # Pre-pad ONCE at init so the forward pass never re-pads the full
        # [V, H] weight in HBM on every call.
        self.vocab_size = vocab_size
        v_pad = _round_up(vocab_size, 128)
        if v_pad != vocab_size:
            w = jnp.pad(w, ((0, v_pad - vocab_size), (0, 0)))
            b = jnp.pad(b, (0, v_pad - vocab_size))
        self.weight = w
        self.bias = b

    def __call__(self, input_ids=None, attention_mask=None, hidden_states=None):
        assert hidden_states is not None, (
            "base_model path not implemented; pass hidden_states")
        logits = policy_head(hidden_states, self.weight, self.bias)
        if logits.shape[-1] != self.vocab_size:
            logits = logits[..., :self.vocab_size]
        return logits


if __name__ == "__main__":
    key = jax.random.PRNGKey(0)
    k_h, k_p = jax.random.split(key)

    B, S, H, V = 2, 8, 32, 256  # small synthetic shapes

    hidden_states = jax.random.normal(k_h, (B, S, H), jnp.float32)
    input_ids = jnp.zeros((B, S), jnp.int32)  # unused when hidden_states given

    net = PolicyNetworkPallas(hidden_size=H, vocab_size=V, key=k_p)

    logits = net(input_ids=input_ids, hidden_states=hidden_states)
    logits = jax.block_until_ready(logits)

    # Reference in plain JAX with the same bf16 operand rounding / f32 acc.
    # Tolerance 1e-2 covers the intentional bf16 rounding of the MXU operands.
    xb = hidden_states.reshape(B * S, H).astype(jnp.bfloat16)
    wb = net.weight[:V].astype(jnp.bfloat16)
    ref = lax.dot_general(
        xb, wb,
        dimension_numbers=(((1,), (1,)), ((), ())),
        preferred_element_type=jnp.float32,
    ) + net.bias[:V].astype(jnp.float32)
    ref = ref.reshape(B, S, V).astype(logits.dtype)

    assert logits.shape == (B, S, V)
    assert logits.dtype == jnp.float32
    assert jnp.allclose(logits, ref, atol=1e-2, rtol=1e-2), (
        float(jnp.max(jnp.abs(logits - ref))))

    print("KERNEL_OK")
</pallas_src>

<mosaic_0001>
module attributes {stable_mosaic.version = 11 : i64} {
  func.func @_policy_head_kernel(%arg0: i32, %arg1: i32, %arg2: memref<16x32xbf16, #tpu.memory_space<vmem>>, %arg3: memref<256x32xbf16, #tpu.memory_space<vmem>>, %arg4: memref<1x256xf32, #tpu.memory_space<vmem>>, %arg5: memref<16x256xf32, #tpu.memory_space<vmem>>) attributes {dimension_semantics = [#tpu.dimension_semantics<parallel>, #tpu.dimension_semantics<parallel>], iteration_bounds = array<i64: 1, 1>, scalar_prefetch = 0 : i64, scratch_operands = 0 : i64, tpu.core_type = #tpu.core_type<tc>, window_params = [{transform_indices = @transform_0, window_bounds = array<i64: 16, 32>}, {transform_indices = @transform_1, window_bounds = array<i64: 256, 32>}, {transform_indices = @transform_2, window_bounds = array<i64: 1, 256>}, {transform_indices = @transform_3, window_bounds = array<i64: 16, 256>}]} {
    %c0 = arith.constant 0 : index
    %c0_0 = arith.constant 0 : index
    %0 = vector.load %arg2[%c0, %c0_0] : memref<16x32xbf16, #tpu.memory_space<vmem>>, vector<16x32xbf16>
    %c0_1 = arith.constant 0 : index
    %c0_2 = arith.constant 0 : index
    %1 = vector.load %arg3[%c0_1, %c0_2] : memref<256x32xbf16, #tpu.memory_space<vmem>>, vector<256x32xbf16>
    %cst = arith.constant dense<0.000000e+00> : vector<16x256xf32>
    %2 = tpu.matmul %0, %1, %cst {dimension_numbers = #tpu.dot_dimension_numbers<[1], [1], [0], [0], [0, 0, 1, 0], [], []>} : vector<16x32xbf16>, vector<256x32xbf16>, vector<16x256xf32> -> vector<16x256xf32>
    %c0_3 = arith.constant 0 : index
    %c0_4 = arith.constant 0 : index
    %3 = vector.load %arg4[%c0_3, %c0_4] : memref<1x256xf32, #tpu.memory_space<vmem>>, vector<1x256xf32>
    %4 = vector.broadcast %3 : vector<1x256xf32> to vector<16x256xf32>
    %5 = arith.addf %2, %4 : vector<16x256xf32>
    %c0_5 = arith.constant 0 : index
    %c0_6 = arith.constant 0 : index
    %6 = vector.load %arg5[%c0_5, %c0_6] : memref<16x256xf32, #tpu.memory_space<vmem>>, vector<16x256xf32>
    tpu.vector_store %arg5[%c0_5, %c0_6], %5 {strides = array<i32>} : memref<16x256xf32, #tpu.memory_space<vmem>>, vector<16x256xf32>,
    return
  }
  func.func @transform_0(%arg0: i32, %arg1: i32) -> (i32, i32) {
    %c0_i32 = arith.constant 0 : i32
    %c0_i32_0 = arith.constant 0 : i32
    return %arg0, %c0_i32 : i32, i32
  }
  func.func @transform_1(%arg0: i32, %arg1: i32) -> (i32, i32) {
    %c0_i32 = arith.constant 0 : i32
    %c0_i32_0 = arith.constant 0 : i32
    return %arg1, %c0_i32 : i32, i32
  }
  func.func @transform_2(%arg0: i32, %arg1: i32) -> (i32, i32) {
    %c0_i32 = arith.constant 0 : i32
    %c0_i32_0 = arith.constant 0 : i32
    return %c0_i32, %arg1 : i32, i32
  }
  func.func @transform_3(%arg0: i32, %arg1: i32) -> (i32, i32) {
    %c0_i32 = arith.constant 0 : i32
    return %arg0, %arg1 : i32, i32
  }
}

</mosaic_0001>

<bundles_post_ra>
// kernel: tpu_custom_call.1
= control target key start
LH: loop header
LB: loop body
LE: loop exit
PB: predicated region body
PF: predicated region fallthrough
CT: control target
= control target key end

     0   :  { %vm147_vm0 = vcmask 261120   ;;  %s457_s0 = inlined_call_operand.vmem [shape: bf16[16,32], index: 0, kind: input, shape index: {}]   ;;  %s458_s1 = inlined_call_operand.vmem [shape: bf16[256,32], index: 1, kind: input, shape index: {}]   ;;  %s459_s2 = inlined_call_operand.vmem [shape: f32[1,256], index: 2, kind: input, shape index: {}]   ;;  %s460_s3 = inlined_call_operand.hbm [shape: f32[16,256], index: 3, kind: output, shape index: {}]  }
   0x1   :  { %v309_v0 = vld [vmem:[%s458_s1 + $0x40] sm:$0xff]   ;;  %v311_v2 = vld [vmem:[%s458_s1 + $0x48] sm:$0xff]   ;;  %v313_v6 = vld [vmem:[%s458_s1 + $0x50] sm:$0xff]  }
   0x2   :  { %v310_v1 = vld [vmem:[%s458_s1] sm:$0xff]   ;;  %298 = vmatprep.subr.msk.bf16.mxu0 %vm147_vm0, %v309_v0  ;;  %v312_v4 = vld [vmem:[%s458_s1 + $0x8] sm:$0xff]   ;;  %v314_v7 = vld [vmem:[%s458_s1 + $0x10] sm:$0xff]  }
   0x3   :  { %v152_v3 = vsel %vm147_vm0, %v310_v1, 0  ;;  %v155_v5 = vsel %vm147_vm0, %v312_v4, 0  ;;  %v325_v8 = vld [vmem:[%s457_s0] sm:$0xff]   ;;  %v158_v9 = vsel %vm147_vm0, %v314_v7, 0  ;;  %v315_v10 = vld [vmem:[%s458_s1 + $0x58] sm:$0xff]  }
   0x4   :  { %281 = vmatpush3.bf16.xpose.msra.mxu0 %v152_v3 }
   0x5   :  { %299 = vmatprep.subr.msk.bf16.mxu0 %vm147_vm0, %v311_v2 }
   0xc   :  { %283 = vmatpush3.bf16.xpose.msra.mxu0 %v155_v5 }
   0xd   :  { %300 = vmatprep.subr.msk.bf16.mxu0 %vm147_vm0, %v313_v6 }
   0xe   :  { %8 = vsyncpa [#allocation3], 0  ;;  %296 = vmatprep.mubr.msk.bf16.mxu0 %vm147_vm0, %v325_v8  ;;  %v316_v11 = vld [vmem:[%s458_s1 + $0x18] sm:$0xff]   ;;  %v317_v13 = vld [vmem:[%s458_s1 + $0x60] sm:$0xff]   ;;  %v52_v25 = vlaneseq  ;;  %s350_s20 = smov [#allocation2]  }
   0xf   :  { %v161_v12 = vsel %vm147_vm0, %v316_v11, 0  ;;  %v318_v14 = vld [vmem:[%s458_s1 + $0x20] sm:$0xff]   ;;  %v319_v16 = vld [vmem:[%s458_s1 + $0x68] sm:$0xff]   ;;  %v321_v19 = vld [vmem:[%s458_s1 + $0x70] sm:$0xff]   ;;  %s251_s21 = sshll.u32 %s350_s20, 4  ;;  %s252_s21 = int_to_ptr.vmem [resolvable:$true] %s251_s21 }
  0x10   :  { %v164_v15 = vsel %vm147_vm0, %v318_v14, 0  ;;  %v320_v17 = vld [vmem:[%s458_s1 + $0x28] sm:$0xff]   ;;  %v322_v20 = vld [vmem:[%s458_s1 + $0x30] sm:$0xff]   ;;  %v323_v22 = vld [vmem:[%s458_s1 + $0x78] sm:$0xff]   ;;  %v53_v26 = vshrl.u32 %v52_v25, 7  ;;  %p331_p1 = scmp.lt.s32.totalorder %s252_s21, %s252_s21 }
  0x11   :  { %v167_v18 = vsel %vm147_vm0, %v320_v17, 0  ;;  %v170_v21 = vsel %vm147_vm0, %v322_v20, 0  ;;  %v324_v23 = vld [vmem:[%s458_s1 + $0x38] sm:$0xff]   ;;  %v50_v28 = vld [vmem:[%s459_s2] sm:$0x3]  ;;  %s326_s1 = scalar_lea.vmem %s252_s21, 512 }
  0x12   :  { %v173_v24 = vsel %vm147_vm0, %v324_v23, 0  ;;  %v54_v27 = vsub.s32 0, %v53_v26  ;;  %v58_v29 = vsub.s32 1, %v53_v26  ;;  %p327_p0 = scmp.ne.s32.totalorder %s252_s21, %s326_s1  ;;  %p332_p2 = scmp.lt.s32.totalorder %s326_s1, %s326_s1 }
  0x14   :  { %285 = vmatpush3.bf16.xpose.msra.mxu0 %v158_v9  ;;  %v55_v30 = vrot.slane %v50_v28, %v54_v27  ;;  %v59_v31 = vrot.slane %v50_v28, %v58_v29  ;;  %p333_p3 = por %p332_p2, %p331_p1 }
  0x15   :  { %301 = vmatprep.subr.msk.bf16.mxu0 %vm147_vm0, %v315_v10 }
  0x16   :  { %p334_p4 = pnand %p333_p3, %p327_p0 }
  0x1c   :  { %287 = vmatpush3.bf16.xpose.msra.mxu0 %v161_v12 }
  0x1d   :  { %302 = vmatprep.subr.msk.bf16.mxu0 %vm147_vm0, %v317_v13 }
  0x24   :  { %289 = vmatpush3.bf16.xpose.msra.mxu0 %v164_v15 }
  0x25   :  { %303 = vmatprep.subr.msk.bf16.mxu0 %vm147_vm0, %v319_v16 }
  0x2c   :  { %291 = vmatpush3.bf16.xpose.msra.mxu0 %v167_v18 }
  0x2d   :  { %304 = vmatprep.subr.msk.bf16.mxu0 %vm147_vm0, %v321_v19 }
  0x34   :  { %293 = vmatpush3.bf16.xpose.msra.mxu0 %v170_v21 }
  0x35   :  { %305 = vmatprep.subr.msk.bf16.mxu0 %vm147_vm0, %v323_v22 }
  0x3c   :  { %295 = vmatpush3.bf16.xpose.msra.mxu0 %v173_v24 }
  0x43   :  { %297 = vmatmul.mubr.msk.bf16.vlgmr.msra.gmra.mrb[0].mxu0 %vm147_vm0, %v325_v8 }
 0x116   :  { %v233_v32 = vpop.f32.mrb[0].mxu0 }
 0x117   :  { %v234_v33 = vadd.f32 %v233_v32, %v55_v30  ;;  %v235_v34 = vpop.f32.mrb[1].mxu0 }
 0x118   :  { %v236_v35 = vadd.f32 %v235_v34, %v59_v31  ;;  %v237_v36 = vpop.f32.mrb[2].mxu0 }
 0x119   :  { %242 = vst [vmem:[#allocation2] sm:$0xff] %v234_v33  ;;  %v238_v37 = vadd.f32 %v237_v36, %v55_v30  ;;  %v239_v38 = vpop.f32.mrb[3].mxu0 }
 0x11a   :  { %243 = vst [vmem:[#allocation2 + $0x8] sm:$0xff] %v236_v35  ;;  %v240_v39 = vadd.f32 %v239_v38, %v59_v31 }
 0x11b   :  { %244 = vst [vmem:[#allocation2 + $0x10] sm:$0xff] %v238_v37 }
 0x11c   :  { %245 = vst [vmem:[#allocation2 + $0x18] sm:$0xff] %v240_v39 }
 0x11d   :  { %337 = shalt.err (!%p334_p4)
}
 0x11e   :  { %s338_s23 = scalar_lea.hbm %s460_s3, 512 }
 0x11f   :  { %p339_p5 = scmp.ne.s32.totalorder %s460_s3, %s338_s23  ;;  %p342_p6 = scmp.lt.u32.totalorder %s338_s23, %s460_s3 }
 0x121   :  { %p344_p7 = pnand %p342_p6, %p339_p5 }
 0x123   :  { %347 = shalt.err (!%p344_p7)
}
 0x124   :  { %s351_s28 = smov 256   ;;  %s352_s29 = smov 16  }
 0x125   :  { %257 = dma.vmem_to_hbm [thread:$0]  %s252_s21, 512, %s460_s3, [#allocation3], %s351_s28, %s351_s28, %s352_s29  }
 0x126   :  { %348 = dma.done.wait [#allocation3], 512  }
 0x127   :  { %349 = vsyncadd [#allocation3], 4294966784 }
 0x128   :  { %261 = vsyncpa [#allocation3], 1 }

</bundles_post_ra>
